<compile_context>
chip_gen: v6e
topology: v6e:2x2x1
jax: 0.10.0
libtpu: 0.0.40
codegen_flags: <defaults>
</compile_context>

<pallas_src>
import functools

import jax
import jax.numpy as jnp
from jax.experimental import pallas as pl
from jax.experimental.pallas import tpu as pltpu

COMPUTE_DTYPE = jnp.bfloat16   # MXU-input / inter-block carrier dtype
ACC_DTYPE = jnp.float32        # in-kernel accumulator dtype


def _round_up(x, m):
    return ((x + m - 1) // m) * m


# ---------------------------------------------------------------------------
# In-kernel helper: 3x3 'same' conv as 9 shifted matmuls (im2col fused in VMEM)
#   x_ref : (H+2, W+2, Cin) zero-padded input window (Ref, bf16)
#   w_ref : (9, Cin, Cout)  weights, k = 3*dh + dw     (Ref, bf16)
# returns an (H*W, Cout) f32 accumulator (no bias / activation applied).
# ---------------------------------------------------------------------------
def _conv3x3_accum(x_ref, w_ref, H, W):
    cin, cout = w_ref.shape[1], w_ref.shape[2]
    acc = jnp.zeros((H * W, cout), ACC_DTYPE)
    for k in range(9):                       # static unroll: 9 MXU calls
        dh, dw = divmod(k, 3)
        xs = x_ref[dh:dh + H, dw:dw + W, :].reshape(H * W, cin)
        acc = acc + jnp.dot(xs, w_ref[k], preferred_element_type=ACC_DTYPE)
    return acc


# ---------------------------------------------------------------------------
# Kernel 1: fused Decoder_block = concat (as split weights) + convA + convB
#           + LeakyReLU(slope), one batch image per grid step.
# ---------------------------------------------------------------------------
def _decoder_block_kernel(up_ref, skip_ref, wAu_ref, wAs_ref, bA_ref,
                          wB_ref, bB_ref, o_ref, a_pad_ref, *, slope):
    H, W, Cm = o_ref.shape
    # convA over the virtually concatenated [up, skip] channels.
    acc = _conv3x3_accum(up_ref, wAu_ref, H, W)
    acc = acc + _conv3x3_accum(skip_ref, wAs_ref, H, W)
    acc = acc + bA_ref[...]                                   # (H*W, Cm) f32
    # Stage convA output with a zero halo in VMEM scratch for convB's im2col.
    a_pad_ref[...] = jnp.zeros_like(a_pad_ref)
    a_pad_ref[1:H + 1, 1:W + 1, :] = (
        acc.reshape(H, W, Cm).astype(a_pad_ref.dtype))
    # convB + bias + LeakyReLU.
    out = _conv3x3_accum(a_pad_ref, wB_ref, H, W) + bB_ref[...]
    out = jnp.where(out >= 0.0, out, slope * out)
    o_ref[...] = out.reshape(H, W, Cm).astype(o_ref.dtype)


def decoder_block(x, skip, p, slope=0.2):
    """x: (N,H,W,Cx) NHWC, skip: (N,2H,2W,Cs). Returns (N,2H,2W,Cm) bf16."""
    up = upsample_bilinear_x2(x)                              # plain-JAX glue
    N, H2, W2, Cx = up.shape
    Cs = skip.shape[-1]
    Cm = p["bA"].shape[-1]
    up_p = jnp.pad(up.astype(COMPUTE_DTYPE), ((0, 0), (1, 1), (1, 1), (0, 0)))
    sk_p = jnp.pad(skip.astype(COMPUTE_DTYPE), ((0, 0), (1, 1), (1, 1), (0, 0)))

    kernel = functools.partial(_decoder_block_kernel, slope=slope)
    return pl.pallas_call(
        kernel,
        out_shape=jax.ShapeDtypeStruct((N, H2, W2, Cm), COMPUTE_DTYPE),
        grid=(N,),
        in_specs=[
            pl.BlockSpec((None, H2 + 2, W2 + 2, Cx), lambda n: (n, 0, 0, 0)),
            pl.BlockSpec((None, H2 + 2, W2 + 2, Cs), lambda n: (n, 0, 0, 0)),
            # Resident weights/biases: constant index_map, re-used every step.
            pl.BlockSpec((9, Cx, Cm), lambda n: (0, 0, 0)),
            pl.BlockSpec((9, Cs, Cm), lambda n: (0, 0, 0)),
            pl.BlockSpec((1, Cm), lambda n: (0, 0)),
            pl.BlockSpec((9, Cm, Cm), lambda n: (0, 0, 0)),
            pl.BlockSpec((1, Cm), lambda n: (0, 0)),
        ],
        out_specs=pl.BlockSpec((None, H2, W2, Cm), lambda n: (n, 0, 0, 0)),
        scratch_shapes=[pltpu.VMEM((H2 + 2, W2 + 2, Cm), COMPUTE_DTYPE)],
        compiler_params=pltpu.CompilerParams(
            dimension_semantics=("parallel",)),
    )(up_p, sk_p, p["wA_up"], p["wA_skip"], p["bA"], p["wB"], p["bB"])


# ---------------------------------------------------------------------------
# Kernel 2: single 3x3 conv (depth head), fused im2col, one image per step.
# ---------------------------------------------------------------------------
def _conv3x3_kernel(x_ref, w_ref, b_ref, o_ref):
    H, W, Cout = o_ref.shape
    acc = _conv3x3_accum(x_ref, w_ref, H, W) + b_ref[...]
    o_ref[...] = acc.reshape(H, W, Cout).astype(o_ref.dtype)


def conv3x3(x, w, b, out_dtype=jnp.float32):
    """x: (N,H,W,Cin), w: (9,Cin,Cout), b: (1,Cout) -> (N,H,W,Cout)."""
    N, H, W, Cin = x.shape
    Cout = w.shape[-1]
    xp = jnp.pad(x.astype(COMPUTE_DTYPE), ((0, 0), (1, 1), (1, 1), (0, 0)))
    return pl.pallas_call(
        _conv3x3_kernel,
        out_shape=jax.ShapeDtypeStruct((N, H, W, Cout), out_dtype),
        grid=(N,),
        in_specs=[
            pl.BlockSpec((None, H + 2, W + 2, Cin), lambda n: (n, 0, 0, 0)),
            pl.BlockSpec((9, Cin, Cout), lambda n: (0, 0, 0)),
            pl.BlockSpec((1, Cout), lambda n: (0, 0)),
        ],
        out_specs=pl.BlockSpec((None, H, W, Cout), lambda n: (n, 0, 0, 0)),
        compiler_params=pltpu.CompilerParams(
            dimension_semantics=("parallel",)),
    )(xp, w, b)


# ---------------------------------------------------------------------------
# Kernel 3: 1x1 conv as row-tiled matmul with fused pre-ReLU + bias.
# ---------------------------------------------------------------------------
def _matmul_bias_kernel(x_ref, w_ref, b_ref, o_ref, *, pre_relu):
    x = x_ref[...]
    if pre_relu:
        x = jnp.maximum(x, 0)                         # F.relu before the conv
    acc = jnp.dot(x, w_ref[...], preferred_element_type=ACC_DTYPE)
    acc = acc + b_ref[...]
    o_ref[...] = acc.astype(o_ref.dtype)


def conv1x1(x, w, b, *, pre_relu=False, tm=512):
    """x: (N,H,W,Cin), w: (Cin,Cout), b: (1,Cout) -> (N,H,W,Cout) bf16."""
    N, H, W, Cin = x.shape
    Cout = w.shape[-1]
    M = N * H * W
    xm = x.reshape(M, Cin).astype(COMPUTE_DTYPE)
    tm = min(tm, _round_up(M, 128))          # big row tiles, don't over-pad
    Mp = _round_up(M, tm)
    if Mp != M:                              # padded tail (rows are discarded)
        xm = jnp.pad(xm, ((0, Mp - M), (0, 0)))
    kernel = functools.partial(_matmul_bias_kernel, pre_relu=pre_relu)
    out = pl.pallas_call(
        kernel,
        out_shape=jax.ShapeDtypeStruct((Mp, Cout), COMPUTE_DTYPE),
        grid=(Mp // tm,),
        in_specs=[
            pl.BlockSpec((tm, Cin), lambda i: (i, 0)),
            pl.BlockSpec((Cin, Cout), lambda i: (0, 0)),
            pl.BlockSpec((1, Cout), lambda i: (0, 0)),
        ],
        out_specs=pl.BlockSpec((tm, Cout), lambda i: (i, 0)),
        compiler_params=pltpu.CompilerParams(
            dimension_semantics=("parallel",)),
    )(xm, w, b)
    return out[:M].reshape(N, H, W, Cout)


# ---------------------------------------------------------------------------
# Bilinear x2 upsample, align_corners=True (matches nn.Upsample) — JAX glue
# ---------------------------------------------------------------------------
def upsample_bilinear_x2(x):
    N, H, W, C = x.shape

    def lin(size):
        out = 2 * size
        src = jnp.arange(out, dtype=jnp.float32) * (size - 1) / (out - 1)
        i0 = jnp.floor(src).astype(jnp.int32)
        i1 = jnp.minimum(i0 + 1, size - 1)
        return i0, i1, src - i0.astype(jnp.float32)

    h0, h1, hf = lin(H)
    w0, w1, wf = lin(W)
    xh = (x[:, h0, :, :] * (1.0 - hf)[None, :, None, None]
          + x[:, h1, :, :] * hf[None, :, None, None])
    xw = (xh[:, :, w0, :] * (1.0 - wf)[None, None, :, None]
          + xh[:, :, w1, :] * wf[None, None, :, None])
    return xw


# ---------------------------------------------------------------------------
# Decoder forward
# ---------------------------------------------------------------------------
def decoder_forward(features, params, slope=0.2):
    conv1, pool1, pool2, pool3, enc = (features[2], features[4], features[7],
                                       features[14], features[19])
    # encoder_output = self.conv2(F.relu(encoder_output))   (pre-ReLU fused)
    enc = conv1x1(enc, params["w2"], params["b2"], pre_relu=True)
    x = decoder_block(enc, pool3, params["block1"], slope)
    x = decoder_block(x, pool2, params["block2"], slope)
    x = decoder_block(x, pool1, params["block3"], slope)
    x = decoder_block(x, conv1, params["block4"], slope)
    depth = conv3x3(x, params["w3"], params["b3"], out_dtype=jnp.float32)
    # Cout == 1, so NHWC (N,H,W,1) and NCHW (N,1,H,W) hold identical flat
    # data: reshape is free (no transpose pass over HBM).
    N, H, W, _ = depth.shape
    return depth.reshape(N, 1, H, W)


# ---------------------------------------------------------------------------
# Deterministic parameter init (kernel-ready layouts; shapes from __init__)
# ---------------------------------------------------------------------------
def init_params(key, encoder_out, skip):
    b1_out = encoder_out // 2
    b2_out = b1_out // 2
    b3_out = b2_out // 2
    b4_out = b3_out // 2
    up_ch = [encoder_out, b1_out, b2_out, b3_out]
    skip_ch = [skip, skip // 3, skip // 4, skip // 6]
    out_ch = [b1_out, b2_out, b3_out, b4_out]

    def conv_init(k, kh, kw, cin, cout):
        kw_key, kb_key = jax.random.split(k)
        scale = 1.0 / jnp.sqrt(kh * kw * cin)
        w = jax.random.normal(kw_key, (kh, kw, cin, cout), jnp.float32) * scale
        b = jax.random.normal(kb_key, (cout,), jnp.float32) * scale
        return w, b

    keys = jax.random.split(key, 10)
    params = {}
    w2, b2 = conv_init(keys[0], 1, 1, encoder_out, encoder_out)
    params["w2"] = w2.reshape(encoder_out, encoder_out).astype(COMPUTE_DTYPE)
    params["b2"] = b2.reshape(1, encoder_out)
    for i in range(4):
        cu, cs, co = up_ch[i], skip_ch[i], out_ch[i]
        wA, bA = conv_init(keys[1 + 2 * i], 3, 3, cu + cs, co)
        wB, bB = conv_init(keys[2 + 2 * i], 3, 3, co, co)
        params[f"block{i + 1}"] = {
            # concat([up, skip]) is realized as two weight slabs.
            "wA_up":   wA[:, :, :cu, :].reshape(9, cu, co).astype(COMPUTE_DTYPE),
            "wA_skip": wA[:, :, cu:, :].reshape(9, cs, co).astype(COMPUTE_DTYPE),
            "bA": bA.reshape(1, co),
            "wB": wB.reshape(9, co, co).astype(COMPUTE_DTYPE),
            "bB": bB.reshape(1, co),
        }
    w3, b3 = conv_init(keys[9], 3, 3, b4_out, 1)
    params["w3"] = w3.reshape(9, b4_out, 1).astype(COMPUTE_DTYPE)
    params["b3"] = b3.reshape(1, 1)
    return params


# ---------------------------------------------------------------------------
if __name__ == "__main__":
    # Small configuration consistent with the module's channel arithmetic.
    encoder_out, skip = 32, 24
    batch, enc_hw = 2, 2          # encoder output 2x2 -> final depth 32x32

    key = jax.random.PRNGKey(0)
    kp, k1, k2, k3, k4, k5 = jax.random.split(key, 6)
    params = init_params(kp, encoder_out, skip)

    # Feature pyramid (NHWC): channels/spatials chosen so each block's concat
    # matches the conv input-channel counts in the module's __init__.
    enc = jax.random.normal(k1, (batch, enc_hw, enc_hw, encoder_out), jnp.float32)
    pool3 = jax.random.normal(k2, (batch, 2 * enc_hw, 2 * enc_hw, skip), jnp.float32)
    pool2 = jax.random.normal(k3, (batch, 4 * enc_hw, 4 * enc_hw, skip // 3), jnp.float32)
    pool1 = jax.random.normal(k4, (batch, 8 * enc_hw, 8 * enc_hw, skip // 4), jnp.float32)
    conv1 = jax.random.normal(k5, (batch, 16 * enc_hw, 16 * enc_hw, skip // 6), jnp.float32)

    features = [None] * 20
    features[2], features[4], features[7], features[14], features[19] = (
        conv1, pool1, pool2, pool3, enc)

    depth = decoder_forward(features, params)
    depth = jax.block_until_ready(depth)
    # 4 decoder blocks => 16x the encoder spatial size.
    assert depth.shape == (batch, 1, 16 * enc_hw, 16 * enc_hw), depth.shape
    assert bool(jnp.all(jnp.isfinite(depth)))
    print("KERNEL_OK")
</pallas_src>

<mosaic_0001>
module attributes {stable_mosaic.version = 11 : i64} {
  func.func @_matmul_bias_kernel(%arg0: i32, %arg1: memref<128x32xbf16, #tpu.memory_space<vmem>>, %arg2: memref<32x32xbf16, #tpu.memory_space<vmem>>, %arg3: memref<1x32xf32, #tpu.memory_space<vmem>>, %arg4: memref<128x32xbf16, #tpu.memory_space<vmem>>) attributes {dimension_semantics = [#tpu.dimension_semantics<parallel>], iteration_bounds = array<i64: 1>, scalar_prefetch = 0 : i64, scratch_operands = 0 : i64, tpu.core_type = #tpu.core_type<tc>, window_params = [{transform_indices = @transform_0, window_bounds = array<i64: 128, 32>}, {pipeline_mode = #tpu.pipeline_mode<synchronous>, transform_indices = @transform_1, window_bounds = array<i64: 32, 32>}, {pipeline_mode = #tpu.pipeline_mode<synchronous>, transform_indices = @transform_2, window_bounds = array<i64: 1, 32>}, {transform_indices = @transform_3, window_bounds = array<i64: 128, 32>}]} {
    %c0 = arith.constant 0 : index
    %c0_0 = arith.constant 0 : index
    %0 = vector.load %arg1[%c0, %c0_0] : memref<128x32xbf16, #tpu.memory_space<vmem>>, vector<128x32xbf16>
    %cst = arith.constant 0.000000e+00 : bf16
    %1 = vector.broadcast %cst : bf16 to vector<128x32xbf16>
    %2 = arith.maximumf %0, %1 : vector<128x32xbf16>
    %c0_1 = arith.constant 0 : index
    %c0_2 = arith.constant 0 : index
    %3 = vector.load %arg2[%c0_1, %c0_2] : memref<32x32xbf16, #tpu.memory_space<vmem>>, vector<32x32xbf16>
    %cst_3 = arith.constant dense<0.000000e+00> : vector<128x32xf32>
    %4 = tpu.matmul %2, %3, %cst_3 {dimension_numbers = #tpu.dot_dimension_numbers<[1], [0], [0], [1], [0, 0, 1, 1], [], []>} : vector<128x32xbf16>, vector<32x32xbf16>, vector<128x32xf32> -> vector<128x32xf32>
    %c0_4 = arith.constant 0 : index
    %c0_5 = arith.constant 0 : index
    %5 = vector.load %arg3[%c0_4, %c0_5] : memref<1x32xf32, #tpu.memory_space<vmem>>, vector<1x32xf32>
    %6 = vector.broadcast %5 : vector<1x32xf32> to vector<128x32xf32>
    %7 = arith.addf %4, %6 : vector<128x32xf32>
    %8 = arith.truncf %7 : vector<128x32xf32> to vector<128x32xbf16>
    %c0_6 = arith.constant 0 : index
    %c0_7 = arith.constant 0 : index
    %9 = vector.load %arg4[%c0_6, %c0_7] : memref<128x32xbf16, #tpu.memory_space<vmem>>, vector<128x32xbf16>
    tpu.vector_store %arg4[%c0_6, %c0_7], %8 {strides = array<i32>} : memref<128x32xbf16, #tpu.memory_space<vmem>>, vector<128x32xbf16>,
    return
  }
  func.func @transform_0(%arg0: i32) -> (i32, i32) {
    %c0_i32 = arith.constant 0 : i32
    %c0_i32_0 = arith.constant 0 : i32
    return %arg0, %c0_i32 : i32, i32
  }
  func.func @transform_1(%arg0: i32) -> (i32, i32) {
    %c0_i32 = arith.constant 0 : i32
    %c0_i32_0 = arith.constant 0 : i32
    %c0_i32_1 = arith.constant 0 : i32
    return %c0_i32, %c0_i32_0 : i32, i32
  }
  func.func @transform_2(%arg0: i32) -> (i32, i32) {
    %c0_i32 = arith.constant 0 : i32
    %c0_i32_0 = arith.constant 0 : i32
    %c0_i32_1 = arith.constant 0 : i32
    return %c0_i32, %c0_i32_0 : i32, i32
  }
  func.func @transform_3(%arg0: i32) -> (i32, i32) {
    %c0_i32 = arith.constant 0 : i32
    %c0_i32_0 = arith.constant 0 : i32
    return %arg0, %c0_i32 : i32, i32
  }
}

</mosaic_0001>

<bundles_post_ra>
// kernel: tpu_custom_call.1
= control target key start
LH: loop header
LB: loop body
LE: loop exit
PB: predicated region body
PF: predicated region fallthrough
CT: control target
= control target key end

     0   :  { %vm110_vm0 = vcmask 261120   ;;  %v405_v5 = vmov 0   ;;  %vm296_vm1 = vcmask 257024   ;;  %s555_s1 = inlined_call_operand.vmem [shape: bf16[32,32], index: 1, kind: input, shape index: {}]   ;;  %s556_s0 = inlined_call_operand.vmem [shape: bf16[128,32], index: 0, kind: input, shape index: {}]   ;;  %s557_s2 = inlined_call_operand.vmem [shape: f32[1,32], index: 2, kind: input, shape index: {}]   ;;  %s558_s3 = inlined_call_operand.vmem [shape: bf16[128,32], index: 3, kind: output, shape index: {}]  }
   0x1   :  { %v403_v0 = vld [vmem:[%s555_s1 + $0x8] sm:$0xff]   ;;  %v404_v1 = vld [vmem:[%s555_s1] sm:$0xff]   ;;  %v19_v17 = vld [vmem:[%s556_s0 + $0x10] sm:$0xf] }
   0x2   :  { %378 = vmatprep.subr.bf16.mxu0 %v403_v0  ;;  %398 = vmatprep.subr.bf16.mxu1 %v403_v0  ;;  %v15_v2 = vld [vmem:[%s556_s0] sm:$0xf]  ;;  %v16_v3 = vld [vmem:[%s556_s0 + $0x4] sm:$0xf]  ;;  %v17_v10 = vld [vmem:[%s556_s0 + $0x8] sm:$0xf]  ;;  %v35_v22 = vmax.bf16 %v405_v5, %v19_v17 }
   0x3   :  { %v23_v4 = vld [vmem:[%s556_s0 + $0x20] sm:$0xf]  ;;  %379 = vmatpush3.bf16.msra.mxu0 %v403_v0  ;;  %400 = vmatpush3.bf16.msra.mxu1 %v403_v0  ;;  %v31_v6 = vmax.bf16 %v405_v5, %v15_v2  ;;  %v32_v7 = vmax.bf16 %v405_v5, %v16_v3  ;;  %v24_v8 = vld [vmem:[%s556_s0 + $0x24] sm:$0xf]  ;;  %v18_v11 = vld [vmem:[%s556_s0 + $0xc] sm:$0xf]  ;;  %v33_v13 = vmax.bf16 %v405_v5, %v17_v10 }
   0x4   :  { %v39_v9 = vmax.bf16 %v405_v5, %v23_v4  ;;  %380 = vmatprep.subr.bf16.mxu0 %v404_v1  ;;  %399 = vmatprep.subr.bf16.mxu1 %v404_v1  ;;  %v40_v12 = vmax.bf16 %v405_v5, %v24_v8  ;;  %v34_v14 = vmax.bf16 %v405_v5, %v18_v11  ;;  %v25_v15 = vld [vmem:[%s556_s0 + $0x28] sm:$0xf]  ;;  %v26_v16 = vld [vmem:[%s556_s0 + $0x2c] sm:$0xf]  ;;  %v20_v21 = vld [vmem:[%s556_s0 + $0x14] sm:$0xf] }
   0x5   :  { %v318_v18 = vcombine.low %v31_v6, %v32_v7  ;;  %v41_v19 = vmax.bf16 %v405_v5, %v25_v15  ;;  %v42_v20 = vmax.bf16 %v405_v5, %v26_v16  ;;  %v27_v23 = vld [vmem:[%s556_s0 + $0x30] sm:$0xf]  ;;  %v28_v24 = vld [vmem:[%s556_s0 + $0x34] sm:$0xf]  ;;  %v36_v27 = vmax.bf16 %v405_v5, %v20_v21  ;;  %v21_v29 = vld [vmem:[%s556_s0 + $0x18] sm:$0xf] }
   0x6   :  { %v322_v25 = vcombine.low %v39_v9, %v40_v12  ;;  %v319_v26 = vcombine.low %v33_v13, %v34_v14  ;;  %v43_v28 = vmax.bf16 %v405_v5, %v27_v23  ;;  %v44_v31 = vmax.bf16 %v405_v5, %v28_v24  ;;  %v22_v32 = vld [vmem:[%s556_s0 + $0x1c] sm:$0xf]  ;;  %v29_v33 = vld [vmem:[%s556_s0 + $0x38] sm:$0xf]  ;;  %v317_v43 = vld [vmem:[%s557_s2] ss:$0 sm:$0xff] }
   0x7   :  { %381 = vmatpush3.bf16.msra.mxu0 %v404_v1  ;;  %401 = vmatpush3.bf16.msra.mxu1 %v404_v1  ;;  %v323_v30 = vcombine.low %v41_v19, %v42_v20  ;;  %v30_v34 = vld [vmem:[%s556_s0 + $0x3c] sm:$0xf]  ;;  %v320_v35 = vcombine.low %v35_v22, %v36_v27  ;;  %v37_v37 = vmax.bf16 %v405_v5, %v21_v29 }
   0x8   :  { %382 = vmatprep.mubr.msk.bf16.mxu0 %vm110_vm0, %v318_v18  ;;  %390 = vmatprep.mubr.msk.bf16.mxu1 %vm110_vm0, %v322_v25  ;;  %v324_v36 = vcombine.low %v43_v28, %v44_v31  ;;  %v38_v38 = vmax.bf16 %v405_v5, %v22_v32  ;;  %v45_v39 = vmax.bf16 %v405_v5, %v29_v33 }
   0x9   :  { %v46_v40 = vmax.bf16 %v405_v5, %v30_v34 }
   0xa   :  { %383 = vmatmul.mubr.msk.bf16.vlgmr.msra.gmra.mxu0 %vm110_vm0, %v319_v26  ;;  %391 = vmatmul.mubr.msk.bf16.vlgmr.msra.gmra.mxu1 %vm110_vm0, %v323_v30  ;;  %v321_v41 = vcombine.low %v37_v37, %v38_v38 }
   0xb   :  { %386 = vmatprep.mubr.msk.bf16.mxu0 %vm110_vm0, %v320_v35  ;;  %394 = vmatprep.mubr.msk.bf16.mxu1 %vm110_vm0, %v324_v36  ;;  %v325_v42 = vcombine.low %v45_v39, %v46_v40 }
  0x12   :  { %387 = vmatmul.mubr.msk.bf16.gmra.mxu0 %vm110_vm0, %v321_v41  ;;  %395 = vmatmul.mubr.msk.bf16.gmra.mxu1 %vm110_vm0, %v325_v42 }
  0xca   :  { %v384_v44 = vpop.f32.mrf.mxu0  ;;  %v392_v45 = vpop.f32.mrf.mxu1 }
  0xcb   :  { %v178_v46 = vadd.f32 %v384_v44, %v317_v43  ;;  %v210_v47 = vadd.f32 %v392_v45, %v317_v43 }
  0xcc   :  { %v169_v48 = vpop.f32.mrf.mxu0  ;;  %v201_v49 = vpop.f32.mrf.mxu1 }
  0xcd   :  { %v354_v50 = vpack.c.bf16 %v178_v46, %v178_v46  ;;  %v362_v51 = vpack.c.bf16 %v210_v47, %v210_v47  ;;  %v170_v52 = vadd.f32 %v317_v43, %v169_v48  ;;  %v202_v53 = vadd.f32 %v317_v43, %v201_v49 }
  0xce   :  { %v385_v54 = vpop.f32.mrf.mxu0  ;;  %v393_v55 = vpop.f32.mrf.mxu1 }
  0xcf   :  { %299 = vst.msk [vmem:[%s558_s3 + $0x8] sm:$0xf] %vm296_vm1, %v354_v50  ;;  %307 = vst.msk [vmem:[%s558_s3 + $0x28] sm:$0xf] %vm296_vm1, %v362_v51  ;;  %v352_v56 = vpack.c.bf16 %v170_v52, %v170_v52  ;;  %v360_v57 = vpack.c.bf16 %v202_v53, %v202_v53  ;;  %v181_v58 = vadd.f32 %v385_v54, %v317_v43 }
  0xd0   :  { %v213_v59 = vadd.f32 %v393_v55, %v317_v43  ;;  %v172_v60 = vpop.f32.mrf.mxu0  ;;  %v204_v61 = vpop.f32.mrf.mxu1 }
  0xd1   :  { %297 = vst.msk [vmem:[%s558_s3] sm:$0xf] %vm296_vm1, %v352_v56  ;;  %305 = vst.msk [vmem:[%s558_s3 + $0x20] sm:$0xf] %vm296_vm1, %v360_v57  ;;  %v355_v62 = vpack.c.bf16 %v181_v58, %v181_v58  ;;  %v173_v0 = vadd.f32 %v317_v43, %v172_v60  ;;  %v205_v1 = vadd.f32 %v317_v43, %v204_v61 }
  0xd2   :  { %v363_v63 = vpack.c.bf16 %v213_v59, %v213_v59  ;;  %v388_v2 = vpop.f32.mrf.mxu0  ;;  %v396_v3 = vpop.f32.mrf.mxu1 }
  0xd3   :  { %300 = vst.msk [vmem:[%s558_s3 + $0xc] sm:$0xf] %vm296_vm1, %v355_v62  ;;  %v353_v4 = vpack.c.bf16 %v173_v0, %v173_v0  ;;  %v361_v5 = vpack.c.bf16 %v205_v1, %v205_v1  ;;  %v194_v6 = vadd.f32 %v388_v2, %v317_v43  ;;  %v226_v7 = vadd.f32 %v396_v3, %v317_v43 }
  0xd4   :  { %308 = vst.msk [vmem:[%s558_s3 + $0x2c] sm:$0xf] %vm296_vm1, %v363_v63  ;;  %v185_v8 = vpop.f32.mrf.mxu0  ;;  %v217_v9 = vpop.f32.mrf.mxu1 }
  0xd5   :  { %298 = vst.msk [vmem:[%s558_s3 + $0x4] sm:$0xf] %vm296_vm1, %v353_v4  ;;  %306 = vst.msk [vmem:[%s558_s3 + $0x24] sm:$0xf] %vm296_vm1, %v361_v5  ;;  %v358_v10 = vpack.c.bf16 %v194_v6, %v194_v6  ;;  %v366_v11 = vpack.c.bf16 %v226_v7, %v226_v7  ;;  %v186_v12 = vadd.f32 %v317_v43, %v185_v8 }
  0xd6   :  { %v218_v13 = vadd.f32 %v317_v43, %v217_v9  ;;  %v389_v14 = vpop.f32.mrf.mxu0  ;;  %v397_v15 = vpop.f32.mrf.mxu1 }
  0xd7   :  { %303 = vst.msk [vmem:[%s558_s3 + $0x18] sm:$0xf] %vm296_vm1, %v358_v10  ;;  %311 = vst.msk [vmem:[%s558_s3 + $0x38] sm:$0xf] %vm296_vm1, %v366_v11  ;;  %v356_v16 = vpack.c.bf16 %v186_v12, %v186_v12  ;;  %v197_v18 = vadd.f32 %v389_v14, %v317_v43  ;;  %v229_v19 = vadd.f32 %v397_v15, %v317_v43 }
  0xd8   :  { %v364_v17 = vpack.c.bf16 %v218_v13, %v218_v13  ;;  %v188_v20 = vpop.f32.mrf.mxu0  ;;  %v220_v21 = vpop.f32.mrf.mxu1 }
  0xd9   :  { %301 = vst.msk [vmem:[%s558_s3 + $0x10] sm:$0xf] %vm296_vm1, %v356_v16  ;;  %v359_v22 = vpack.c.bf16 %v197_v18, %v197_v18  ;;  %v367_v23 = vpack.c.bf16 %v229_v19, %v229_v19  ;;  %v189_v24 = vadd.f32 %v317_v43, %v188_v20  ;;  %v221_v25 = vadd.f32 %v317_v43, %v220_v21 }
  0xda   :  { %309 = vst.msk [vmem:[%s558_s3 + $0x30] sm:$0xf] %vm296_vm1, %v364_v17 }
  0xdb   :  { %304 = vst.msk [vmem:[%s558_s3 + $0x1c] sm:$0xf] %vm296_vm1, %v359_v22  ;;  %312 = vst.msk [vmem:[%s558_s3 + $0x3c] sm:$0xf] %vm296_vm1, %v367_v23  ;;  %v357_v26 = vpack.c.bf16 %v189_v24, %v189_v24  ;;  %v365_v27 = vpack.c.bf16 %v221_v25, %v221_v25 }
  0xdd   :  { %302 = vst.msk [vmem:[%s558_s3 + $0x14] sm:$0xf] %vm296_vm1, %v357_v26  ;;  %310 = vst.msk [vmem:[%s558_s3 + $0x34] sm:$0xf] %vm296_vm1, %v365_v27 }

</bundles_post_ra>
